<compile_context>
chip_gen: v5e
topology: v5e:2x2
jax: 0.10.0
libtpu: 0.0.40
codegen_flags: <defaults>
</compile_context>

<pallas_src>
import functools

import jax
import jax.numpy as jnp
from jax import lax
from jax.experimental import pallas as pl
from jax.experimental.pallas import tpu as pltpu


# --------------------------------------------------------------------------- #
# Fused kernel: one (tm, tn) adjacency tile =
#   epsilon_mask( (1/P) * Xcat_rows @ Xcat_cols^T )
# with Xcat_* recomputed in-register from the raw feature tiles.
# --------------------------------------------------------------------------- #
def _fused_attention_kernel(xr_ref, xc_ref, w_ref, o_ref, *,
                            num_pers, epsilon, matmul_dtype):
    w = w_ref[...]                                       # (P, D) f32

    def weighted_normalize(x):                           # (rows, D) -> (rows, P*D)
        cols = []
        for p in range(num_pers):                        # static unroll; P is small
            xw = x * w[p:p + 1, :]                       # VPU elementwise
            ssq = jnp.sum(xw * xw, axis=-1, keepdims=True)
            # F.normalize(p=2, eps=1e-12): x / max(||x||,1e-12) == x * rsqrt(max(ssq,1e-24))
            inv = lax.rsqrt(jnp.maximum(ssq, 1e-24))     # EUP rsqrt (own VLIW slot)
            cols.append(xw * inv)
        return jnp.concatenate(cols, axis=-1)

    # Column side is recomputed per tile (cost ~1/tm of the tile matmul, <1%)
    # so both grid axes stay "parallel" with no cross-step state.
    xr = weighted_normalize(xr_ref[...]).astype(matmul_dtype)   # (tm, P*D)
    xc = weighted_normalize(xc_ref[...]).astype(matmul_dtype)   # (tn, P*D)

    # mean_p(xn_p @ xn_p^T) == (1/P) * X_cat @ X_cat^T; contract last dims of
    # both operands -> no transpose before the MXU; f32 accumulation.
    att = lax.dot_general(
        xr, xc,
        dimension_numbers=(((1,), (1,)), ((), ())),
        preferred_element_type=jnp.float32,
    ) * (1.0 / float(num_pers))

    # build_epsilon_neighbourhood with markoff_value = 0; compare in f32, cast
    # only on the store (out dtype may be bf16).
    mask = (att > epsilon).astype(att.dtype)
    o_ref[...] = (att * mask).astype(o_ref.dtype)


def _round_up(x, m):
    return (x + m - 1) // m * m


def _choose_tile(n, tile):
    """Pick (tile_n, padded_n) for the square output tiling."""
    if n <= 256:
        return n, n                                  # single resident block
    # >= 2 steps per parallel axis so both v7x TensorCores get work; multiples
    # of 256 keep the MXU passes full and the (tn, tn) output store lane-dense.
    tn = min(int(tile), _round_up(-(-n // 2), 256))
    tn = max(tn, 256)
    return tn, _round_up(n, tn)


def gl_handler_forward(node_features, weight_tensor, *, epsilon=0.3,
                       matmul_dtype=jnp.float32, out_dtype=None, tile=1024):
    """Forward of GL_handler (eval mode, dropout p=0): returns [N, N] adjacency."""
    N, D = node_features.shape
    P, Dw = weight_tensor.shape
    assert D == Dw
    if out_dtype is None:
        out_dtype = node_features.dtype

    tn, Np = _choose_tile(N, tile)
    # Padded rows are all-zero -> normalize to 0 -> attention 0 -> masked out;
    # they are sliced off below regardless.
    x = node_features if Np == N else jnp.pad(node_features, ((0, Np - N), (0, 0)))

    grid = (Np // tn, Np // tn)
    adj = pl.pallas_call(
        functools.partial(_fused_attention_kernel,
                          num_pers=P,
                          epsilon=float(epsilon),
                          matmul_dtype=matmul_dtype),
        out_shape=jax.ShapeDtypeStruct((Np, Np), out_dtype),
        grid_spec=pltpu.PrefetchScalarGridSpec(
            num_scalar_prefetch=0,
            grid=grid,
            in_specs=[
                pl.BlockSpec((tn, D), lambda i, j: (i, 0)),   # row feature tile
                pl.BlockSpec((tn, D), lambda i, j: (j, 0)),   # col feature tile
                pl.BlockSpec((P, D), lambda i, j: (0, 0)),    # all perspective weights
            ],
            out_specs=pl.BlockSpec((tn, tn), lambda i, j: (i, j)),
        ),
        compiler_params=pltpu.CompilerParams(
            dimension_semantics=("parallel", "parallel"),      # v7x: shard over 2 TCs
            # tile=1024 f32 needs ~10.5 MiB double-buffered; raise past v5e's
            # 16 MiB default for headroom (well under every chip's physical VMEM).
            vmem_limit_bytes=32 * 1024 * 1024,
        ),
    )(x, x, weight_tensor)

    if Np != N:
        adj = adj[:N, :N]
    return adj


# --------------------------------------------------------------------------- #
# Pure-JAX reference mirroring the PyTorch weighted_cosine learner.
# --------------------------------------------------------------------------- #
def _reference(node_features, weight_tensor, epsilon):
    xw = node_features[None, :, :] * weight_tensor[:, None, :]          # (P, N, D)
    norm = jnp.sqrt(jnp.sum(xw * xw, axis=-1, keepdims=True))
    xn = xw / jnp.maximum(norm, 1e-12)
    att = jnp.einsum("pnd,pmd->pnm", xn, xn).mean(axis=0)               # (N, N)
    mask = (att > epsilon).astype(att.dtype)
    return att, att * mask


def _check(adj, att_ref, adj_ref, epsilon, tol):
    # Entries whose (unmasked) attention sits within `tol` of the epsilon
    # threshold may legitimately flip the mask under tiny numeric differences;
    # everything else must match to `tol`.
    adj = adj.astype(jnp.float32)
    ok = (jnp.abs(adj - adj_ref) <= tol) | (jnp.abs(att_ref - epsilon) <= tol)
    assert bool(jnp.all(ok)), "mismatch vs reference"


if __name__ == "__main__":
    key = jax.random.PRNGKey(0)
    k_x, k_w, k_x2 = jax.random.split(key, 3)

    # Small shapes consistent with the module: hid_units=32 hidden size,
    # 16 graph nodes, graph_learn_num_pers=4 perspectives.
    N, D, P = 16, 32, 4
    epsilon = 0.3

    node_features = jax.random.normal(k_x, (N, D), dtype=jnp.float32)

    # Deterministic xavier-uniform init for the weighted-cosine weight tensor.
    limit = (6.0 / (P + D)) ** 0.5
    weight_tensor = jax.random.uniform(
        k_w, (P, D), dtype=jnp.float32, minval=-limit, maxval=limit
    )

    # 1) f32 path (single resident block, grid (1, 1)).
    adj = jax.block_until_ready(
        gl_handler_forward(node_features, weight_tensor, epsilon=epsilon))
    att_ref, adj_ref = _reference(node_features, weight_tensor, epsilon)
    assert adj.shape == (N, N)
    _check(adj, att_ref, adj_ref, epsilon, tol=1e-4)

    # 2) bf16-at-the-MXU operands + bf16 output (v6e/v7x fast path; the epsilon
    #    compare stays on the f32 accumulator).
    adj_bf16 = jax.block_until_ready(
        gl_handler_forward(node_features, weight_tensor, epsilon=epsilon,
                           matmul_dtype=jnp.bfloat16, out_dtype=jnp.bfloat16))
    assert adj_bf16.dtype == jnp.bfloat16
    _check(adj_bf16, att_ref, adj_ref, epsilon, tol=3e-2)

    # 3) Larger graph exercises the tiled path: N=300 -> padded to 512,
    #    tile 256, grid (2, 2) (>= 2 steps per parallel axis for v7x).
    N2 = 300
    node_features2 = jax.random.normal(k_x2, (N2, D), dtype=jnp.float32)
    adj2 = jax.block_until_ready(
        gl_handler_forward(node_features2, weight_tensor, epsilon=epsilon))
    att_ref2, adj_ref2 = _reference(node_features2, weight_tensor, epsilon)
    assert adj2.shape == (N2, N2)
    _check(adj2, att_ref2, adj_ref2, epsilon, tol=1e-4)

    print("KERNEL_OK")
</pallas_src>

<mosaic_0001>
module attributes {stable_mosaic.version = 11 : i64} {
  func.func @_fused_attention_kernel(%arg0: i32, %arg1: i32, %arg2: memref<16x32xf32, #tpu.memory_space<vmem>>, %arg3: memref<16x32xf32, #tpu.memory_space<vmem>>, %arg4: memref<4x32xf32, #tpu.memory_space<vmem>>, %arg5: memref<16x16xf32, #tpu.memory_space<vmem>>) attributes {dimension_semantics = [#tpu.dimension_semantics<parallel>, #tpu.dimension_semantics<parallel>], iteration_bounds = array<i64: 1, 1>, scalar_prefetch = 0 : i64, scratch_operands = 0 : i64, tpu.core_type = #tpu.core_type<tc>, window_params = [{transform_indices = @transform_0, window_bounds = array<i64: 16, 32>}, {transform_indices = @transform_1, window_bounds = array<i64: 16, 32>}, {pipeline_mode = #tpu.pipeline_mode<synchronous>, transform_indices = @transform_2, window_bounds = array<i64: 4, 32>}, {transform_indices = @transform_3, window_bounds = array<i64: 16, 16>}]} {
    %c0 = arith.constant 0 : index
    %c0_0 = arith.constant 0 : index
    %0 = vector.load %arg4[%c0, %c0_0] : memref<4x32xf32, #tpu.memory_space<vmem>>, vector<4x32xf32>
    %c0_1 = arith.constant 0 : index
    %c0_2 = arith.constant 0 : index
    %1 = vector.load %arg2[%c0_1, %c0_2] : memref<16x32xf32, #tpu.memory_space<vmem>>, vector<16x32xf32>
    %2 = vector.extract_strided_slice %0 {offsets = [0, 0], sizes = [1, 32], strides = [1, 1]} : vector<4x32xf32> to vector<1x32xf32>
    %3 = vector.broadcast %2 : vector<1x32xf32> to vector<16x32xf32>
    %4 = arith.mulf %1, %3 : vector<16x32xf32>
    %5 = arith.mulf %4, %4 : vector<16x32xf32>
    %cst = arith.constant dense<0.000000e+00> : vector<16xf32>
    %6 = vector.multi_reduction <add>, %5, %cst [1] : vector<16x32xf32> to vector<16xf32>
    %7 = vector.shape_cast %6 : vector<16xf32> to vector<16x1xf32>
    %cst_3 = arith.constant 1.000000e-24 : f32
    %8 = vector.broadcast %cst_3 : f32 to vector<16x1xf32>
    %9 = arith.maximumf %7, %8 : vector<16x1xf32>
    %10 = math.rsqrt %9 : vector<16x1xf32>
    %11 = vector.broadcast %10 : vector<16x1xf32> to vector<16x32xf32>
    %12 = arith.mulf %4, %11 : vector<16x32xf32>
    %13 = vector.extract_strided_slice %0 {offsets = [1, 0], sizes = [1, 32], strides = [1, 1]} : vector<4x32xf32> to vector<1x32xf32>
    %14 = vector.broadcast %13 : vector<1x32xf32> to vector<16x32xf32>
    %15 = arith.mulf %1, %14 : vector<16x32xf32>
    %16 = arith.mulf %15, %15 : vector<16x32xf32>
    %cst_4 = arith.constant dense<0.000000e+00> : vector<16xf32>
    %17 = vector.multi_reduction <add>, %16, %cst_4 [1] : vector<16x32xf32> to vector<16xf32>
    %18 = vector.shape_cast %17 : vector<16xf32> to vector<16x1xf32>
    %cst_5 = arith.constant 1.000000e-24 : f32
    %19 = vector.broadcast %cst_5 : f32 to vector<16x1xf32>
    %20 = arith.maximumf %18, %19 : vector<16x1xf32>
    %21 = math.rsqrt %20 : vector<16x1xf32>
    %22 = vector.broadcast %21 : vector<16x1xf32> to vector<16x32xf32>
    %23 = arith.mulf %15, %22 : vector<16x32xf32>
    %24 = vector.extract_strided_slice %0 {offsets = [2, 0], sizes = [1, 32], strides = [1, 1]} : vector<4x32xf32> to vector<1x32xf32>
    %25 = vector.broadcast %24 : vector<1x32xf32> to vector<16x32xf32>
    %26 = arith.mulf %1, %25 : vector<16x32xf32>
    %27 = arith.mulf %26, %26 : vector<16x32xf32>
    %cst_6 = arith.constant dense<0.000000e+00> : vector<16xf32>
    %28 = vector.multi_reduction <add>, %27, %cst_6 [1] : vector<16x32xf32> to vector<16xf32>
    %29 = vector.shape_cast %28 : vector<16xf32> to vector<16x1xf32>
    %cst_7 = arith.constant 1.000000e-24 : f32
    %30 = vector.broadcast %cst_7 : f32 to vector<16x1xf32>
    %31 = arith.maximumf %29, %30 : vector<16x1xf32>
    %32 = math.rsqrt %31 : vector<16x1xf32>
    %33 = vector.broadcast %32 : vector<16x1xf32> to vector<16x32xf32>
    %34 = arith.mulf %26, %33 : vector<16x32xf32>
    %35 = vector.extract_strided_slice %0 {offsets = [3, 0], sizes = [1, 32], strides = [1, 1]} : vector<4x32xf32> to vector<1x32xf32>
    %36 = vector.broadcast %35 : vector<1x32xf32> to vector<16x32xf32>
    %37 = arith.mulf %1, %36 : vector<16x32xf32>
    %38 = arith.mulf %37, %37 : vector<16x32xf32>
    %cst_8 = arith.constant dense<0.000000e+00> : vector<16xf32>
    %39 = vector.multi_reduction <add>, %38, %cst_8 [1] : vector<16x32xf32> to vector<16xf32>
    %40 = vector.shape_cast %39 : vector<16xf32> to vector<16x1xf32>
    %cst_9 = arith.constant 1.000000e-24 : f32
    %41 = vector.broadcast %cst_9 : f32 to vector<16x1xf32>
    %42 = arith.maximumf %40, %41 : vector<16x1xf32>
    %43 = math.rsqrt %42 : vector<16x1xf32>
    %44 = vector.broadcast %43 : vector<16x1xf32> to vector<16x32xf32>
    %45 = arith.mulf %37, %44 : vector<16x32xf32>
    %46 = tpu.concatenate %12, %23, %34, %45 in 1 : vector<16x32xf32>, vector<16x32xf32>, vector<16x32xf32>, vector<16x32xf32> -> vector<16x128xf32>
    %c0_10 = arith.constant 0 : index
    %c0_11 = arith.constant 0 : index
    %47 = vector.load %arg3[%c0_10, %c0_11] : memref<16x32xf32, #tpu.memory_space<vmem>>, vector<16x32xf32>
    %48 = vector.extract_strided_slice %0 {offsets = [0, 0], sizes = [1, 32], strides = [1, 1]} : vector<4x32xf32> to vector<1x32xf32>
    %49 = vector.broadcast %48 : vector<1x32xf32> to vector<16x32xf32>
    %50 = arith.mulf %47, %49 : vector<16x32xf32>
    %51 = arith.mulf %50, %50 : vector<16x32xf32>
    %cst_12 = arith.constant dense<0.000000e+00> : vector<16xf32>
    %52 = vector.multi_reduction <add>, %51, %cst_12 [1] : vector<16x32xf32> to vector<16xf32>
    %53 = vector.shape_cast %52 : vector<16xf32> to vector<16x1xf32>
    %cst_13 = arith.constant 1.000000e-24 : f32
    %54 = vector.broadcast %cst_13 : f32 to vector<16x1xf32>
    %55 = arith.maximumf %53, %54 : vector<16x1xf32>
    %56 = math.rsqrt %55 : vector<16x1xf32>
    %57 = vector.broadcast %56 : vector<16x1xf32> to vector<16x32xf32>
    %58 = arith.mulf %50, %57 : vector<16x32xf32>
    %59 = vector.extract_strided_slice %0 {offsets = [1, 0], sizes = [1, 32], strides = [1, 1]} : vector<4x32xf32> to vector<1x32xf32>
    %60 = vector.broadcast %59 : vector<1x32xf32> to vector<16x32xf32>
    %61 = arith.mulf %47, %60 : vector<16x32xf32>
    %62 = arith.mulf %61, %61 : vector<16x32xf32>
    %cst_14 = arith.constant dense<0.000000e+00> : vector<16xf32>
    %63 = vector.multi_reduction <add>, %62, %cst_14 [1] : vector<16x32xf32> to vector<16xf32>
    %64 = vector.shape_cast %63 : vector<16xf32> to vector<16x1xf32>
    %cst_15 = arith.constant 1.000000e-24 : f32
    %65 = vector.broadcast %cst_15 : f32 to vector<16x1xf32>
    %66 = arith.maximumf %64, %65 : vector<16x1xf32>
    %67 = math.rsqrt %66 : vector<16x1xf32>
    %68 = vector.broadcast %67 : vector<16x1xf32> to vector<16x32xf32>
    %69 = arith.mulf %61, %68 : vector<16x32xf32>
    %70 = vector.extract_strided_slice %0 {offsets = [2, 0], sizes = [1, 32], strides = [1, 1]} : vector<4x32xf32> to vector<1x32xf32>
    %71 = vector.broadcast %70 : vector<1x32xf32> to vector<16x32xf32>
    %72 = arith.mulf %47, %71 : vector<16x32xf32>
    %73 = arith.mulf %72, %72 : vector<16x32xf32>
    %cst_16 = arith.constant dense<0.000000e+00> : vector<16xf32>
    %74 = vector.multi_reduction <add>, %73, %cst_16 [1] : vector<16x32xf32> to vector<16xf32>
    %75 = vector.shape_cast %74 : vector<16xf32> to vector<16x1xf32>
    %cst_17 = arith.constant 1.000000e-24 : f32
    %76 = vector.broadcast %cst_17 : f32 to vector<16x1xf32>
    %77 = arith.maximumf %75, %76 : vector<16x1xf32>
    %78 = math.rsqrt %77 : vector<16x1xf32>
    %79 = vector.broadcast %78 : vector<16x1xf32> to vector<16x32xf32>
    %80 = arith.mulf %72, %79 : vector<16x32xf32>
    %81 = vector.extract_strided_slice %0 {offsets = [3, 0], sizes = [1, 32], strides = [1, 1]} : vector<4x32xf32> to vector<1x32xf32>
    %82 = vector.broadcast %81 : vector<1x32xf32> to vector<16x32xf32>
    %83 = arith.mulf %47, %82 : vector<16x32xf32>
    %84 = arith.mulf %83, %83 : vector<16x32xf32>
    %cst_18 = arith.constant dense<0.000000e+00> : vector<16xf32>
    %85 = vector.multi_reduction <add>, %84, %cst_18 [1] : vector<16x32xf32> to vector<16xf32>
    %86 = vector.shape_cast %85 : vector<16xf32> to vector<16x1xf32>
    %cst_19 = arith.constant 1.000000e-24 : f32
    %87 = vector.broadcast %cst_19 : f32 to vector<16x1xf32>
    %88 = arith.maximumf %86, %87 : vector<16x1xf32>
    %89 = math.rsqrt %88 : vector<16x1xf32>
    %90 = vector.broadcast %89 : vector<16x1xf32> to vector<16x32xf32>
    %91 = arith.mulf %83, %90 : vector<16x32xf32>
    %92 = tpu.concatenate %58, %69, %80, %91 in 1 : vector<16x32xf32>, vector<16x32xf32>, vector<16x32xf32>, vector<16x32xf32> -> vector<16x128xf32>
    %cst_20 = arith.constant dense<0.000000e+00> : vector<16x16xf32>
    %93 = tpu.matmul %46, %92, %cst_20 {dimension_numbers = #tpu.dot_dimension_numbers<[1], [1], [0], [0], [0, 0, 1, 0], [], []>} : vector<16x128xf32>, vector<16x128xf32>, vector<16x16xf32> -> vector<16x16xf32>
    %cst_21 = arith.constant 2.500000e-01 : f32
    %94 = vector.broadcast %cst_21 : f32 to vector<16x16xf32>
    %95 = arith.mulf %93, %94 : vector<16x16xf32>
    %cst_22 = arith.constant 3.000000e-01 : f32
    %96 = vector.broadcast %cst_22 : f32 to vector<16x16xf32>
    %97 = arith.cmpf ogt, %95, %96 : vector<16x16xf32>
    %98 = arith.extui %97 : vector<16x16xi1> to vector<16x16xi32>
    %99 = arith.sitofp %98 : vector<16x16xi32> to vector<16x16xf32>
    %100 = arith.mulf %95, %99 : vector<16x16xf32>
    %c0_23 = arith.constant 0 : index
    %c0_24 = arith.constant 0 : index
    %101 = vector.load %arg5[%c0_23, %c0_24] : memref<16x16xf32, #tpu.memory_space<vmem>>, vector<16x16xf32>
    tpu.vector_store %arg5[%c0_23, %c0_24], %100 {strides = array<i32>} : memref<16x16xf32, #tpu.memory_space<vmem>>, vector<16x16xf32>,
    return
  }
  func.func @transform_0(%arg0: i32, %arg1: i32) -> (i32, i32) {
    %c0_i32 = arith.constant 0 : i32
    %c0_i32_0 = arith.constant 0 : i32
    return %arg0, %c0_i32 : i32, i32
  }
  func.func @transform_1(%arg0: i32, %arg1: i32) -> (i32, i32) {
    %c0_i32 = arith.constant 0 : i32
    %c0_i32_0 = arith.constant 0 : i32
    return %arg1, %c0_i32 : i32, i32
  }
  func.func @transform_2(%arg0: i32, %arg1: i32) -> (i32, i32) {
    %c0_i32 = arith.constant 0 : i32
    %c0_i32_0 = arith.constant 0 : i32
    %c0_i32_1 = arith.constant 0 : i32
    return %c0_i32, %c0_i32_0 : i32, i32
  }
  func.func @transform_3(%arg0: i32, %arg1: i32) -> (i32, i32) {
    %c0_i32 = arith.constant 0 : i32
    return %arg0, %arg1 : i32, i32
  }
}

</mosaic_0001>

<bundles_post_ra>
// kernel: tpu_custom_call.1
= control target key start
LH: loop header
LB: loop body
LE: loop exit
PB: predicated region body
PF: predicated region fallthrough
CT: control target
= control target key end

     0   :  { %8 = vsyncpa [#allocation3], 0  ;;  %s975_s0 = inlined_call_operand.hbm [shape: f32[16,32], index: 0, kind: input, shape index: {}]   ;;  %s976_s1 = inlined_call_operand.hbm [shape: f32[16,32], index: 1, kind: input, shape index: {}]   ;;  %s977_s2 = inlined_call_operand.hbm [shape: f32[4,32], index: 2, kind: input, shape index: {}]   ;;  %s978_s3 = inlined_call_operand.hbm [shape: f32[16,16], index: 3, kind: output, shape index: {}]  }
   0x1   :  { %9 = vsyncpa [#allocation6], 0 }
   0x2   :  { %10 = vsyncpa [#allocation4], 0  ;;  %s28_s14 = sshll.u32 %s976_s1, 4  ;;  %s638_s15 = smov [#allocation5]   ;;  %s29_s14 = int_to_ptr.hbm [resolvable:$true] %s28_s14 }
   0x3   :  { %s30_s16 = sshll.u32 %s638_s15, 4  ;;  %s15_s19 = sshll.u32 %s975_s0, 4  ;;  %s31_s16 = int_to_ptr.vmem [resolvable:$true] %s30_s16  ;;  %s16_s19 = int_to_ptr.hbm [resolvable:$true] %s15_s19 }
   0x4   :  { %s639_s20 = smov 128   ;;  %s640_s21 = smov 8  }
   0x5   :  { %36 = dma.hbm_to_vmem [thread:$0]  %s29_s14, 256, %s31_s16, [#allocation6], %s639_s20, %s639_s20, %s640_s21  }
   0x6   :  { %s641_s22 = smov [#allocation2]   ;;  %s42_s1 = sshll.u32 %s977_s2, 4  ;;  %s43_s1 = int_to_ptr.hbm [resolvable:$true] %s42_s1 }
   0x7   :  { %s17_s23 = sshll.u32 %s641_s22, 4  ;;  %s642_s0 = smov [#allocation7]   ;;  %s18_s23 = int_to_ptr.vmem [resolvable:$true] %s17_s23 }
   0x8   :  { %23 = dma.hbm_to_vmem [thread:$0]  %s16_s19, 256, %s18_s23, [#allocation3], %s639_s20, %s639_s20, %s640_s21  }
   0x9   :  { %s44_s26 = sshll.u32 %s642_s0, 4  ;;  %s45_s26 = int_to_ptr.vmem [resolvable:$true] %s44_s26 }
   0xa   :  { %47 = dma.hbm_to_vmem [thread:$0]  %s43_s1, 64, %s45_s26, [#allocation6]  }
   0xb   :  { %632 = dma.done.wait [#allocation3], 256  }
   0xc   :  { %633 = vsyncadd [#allocation3], 4294967040 }
   0xd   :  { %634 = dma.done.wait [#allocation6], 320  }
   0xe   :  { %635 = vsyncadd [#allocation6], 4294966976  ;;  %v60_v0 = vld [vmem:[#allocation7] sm:$0xf]  ;;  %v237_v1 = vld [vmem:[#allocation5 + $0x8] sm:$0xff]  ;;  %vm68_vm0 = vcmask 261120  }
   0xf   :  { %v683_v2 = vld [vmem:[#allocation5] sm:$0xff]  ;;  %v169_v3 = vperm.slane %v60_v0, 3  ;;  %v134_v4 = vperm.slane %v60_v0, 2  ;;  %v99_v5 = vperm.slane %v60_v0, 1  ;;  %v61_v21 = vld [vmem:[#allocation2] sm:$0xff]  ;;  %v62_v22 = vld [vmem:[#allocation2 + $0x8] sm:$0xff] }
  0x10   :  { %v63_v41 = vperm.slane %v60_v0, 0  ;;  %s643_s2 = smov 96   ;;  %s644_s27 = smov 32  }
  0x11   :  { %v685_v6 = vmul.f32 %v237_v1, %v169_v3  ;;  %v688_v7 = vmul.f32 %v683_v2, %v134_v4  ;;  %v690_v8 = vmul.f32 %v237_v1, %v99_v5  ;;  %v693_v9 = vmul.f32 %v683_v2, %v169_v3  ;;  %s645_s28 = smov 64   ;;  %s646_s29 = smov [#allocation8]  }
  0x12   :  { %v702_v13 = vmul.f32 %v683_v2, %v99_v5  ;;  %v704_v14 = vmul.f32 %v237_v1, %v134_v4  ;;  %v717_v25 = vmul.f32 %v134_v4, %v61_v21  ;;  %v719_v26 = vmul.f32 %v99_v5, %v62_v22  ;;  %s444_s30 = sshll.u32 %s646_s29, 4  ;;  %s446_s6 = sshll.u32 %s978_s3, 4  ;;  %s445_s30 = int_to_ptr.vmem [resolvable:$true] %s444_s30  ;;  %s447_s6 = int_to_ptr.hbm [resolvable:$true] %s446_s6 }
  0x13   :  { %v343_v10 = vmul.f32 %v685_v6, %v685_v6  ;;  %v308_v11 = vmul.f32 %v688_v7, %v688_v7  ;;  %v275_v12 = vmul.f32 %v690_v8, %v690_v8  ;;  %v342_v18 = vmul.f32 %v693_v9, %v693_v9 }
  0x14   :  { %v274_v19 = vmul.f32 %v702_v13, %v702_v13  ;;  %v309_v20 = vmul.f32 %v704_v14, %v704_v14  ;;  %v722_v28 = vmul.f32 %v99_v5, %v61_v21  ;;  %v137_v29 = vmul.f32 %v717_v25, %v717_v25 }
  0x15   :  { %v347_v15 = vsel %vm68_vm0, %v343_v10, 0.0  ;;  %v310_v16 = vsel %vm68_vm0, %v308_v11, 0.0  ;;  %v279_v17 = vsel %vm68_vm0, %v275_v12, 0.0  ;;  %v344_v23 = vsel %vm68_vm0, %v342_v18, 0.0 }
  0x16   :  { %348 = vadd.xlane.f32.xlu1 %v347_v15  ;;  %311 = vadd.xlane.f32.xlu2 %v310_v16  ;;  %v276_v24 = vsel %vm68_vm0, %v274_v19, 0.0  ;;  %v313_v27 = vsel %vm68_vm0, %v309_v20, 0.0  ;;  %v103_v30 = vmul.f32 %v719_v26, %v719_v26  ;;  %v102_v31 = vmul.f32 %v722_v28, %v722_v28 }
  0x17   :  { %280 = vadd.xlane.f32.xlu0 %v279_v17  ;;  %v139_v32 = vsel %vm68_vm0, %v137_v29, 0.0  ;;  %v732_v34 = vmul.f32 %v169_v3, %v62_v22  ;;  %v734_v35 = vmul.f32 %v169_v3, %v61_v21  ;;  %v737_v37 = vmul.f32 %v134_v4, %v62_v22 }
  0x18   :  { %v107_v33 = vsel %vm68_vm0, %v103_v30, 0.0  ;;  %v104_v36 = vsel %vm68_vm0, %v102_v31, 0.0  ;;  %v747_v44 = vmul.f32 %v63_v41, %v61_v21  ;;  %v750_v46 = vmul.f32 %v237_v1, %v63_v41 }
  0x19   :  { %v173_v38 = vmul.f32 %v732_v34, %v732_v34  ;;  %v172_v39 = vmul.f32 %v734_v35, %v734_v35  ;;  %v138_v40 = vmul.f32 %v737_v37, %v737_v37  ;;  %v758_v51 = vmul.f32 %v63_v41, %v62_v22 }
  0x1a   :  { %v66_v47 = vmul.f32 %v747_v44, %v747_v44  ;;  %v241_v48 = vmul.f32 %v750_v46, %v750_v46  ;;  %v764_v54 = vmul.f32 %v683_v2, %v63_v41 }
  0x1b   :  { %v177_v42 = vsel %vm68_vm0, %v173_v38, 0.0  ;;  %v174_v43 = vsel %vm68_vm0, %v172_v39, 0.0  ;;  %v142_v45 = vsel %vm68_vm0, %v138_v40, 0.0  ;;  %v67_v52 = vmul.f32 %v758_v51, %v758_v51 }
  0x1c   :  { %v69_v49 = vsel %vm68_vm0, %v66_v47, 0.0  ;;  %v245_v50 = vsel %vm68_vm0, %v241_v48, 0.0  ;;  %v240_v55 = vmul.f32 %v764_v54, %v764_v54 }
  0x1d   :  { %v72_v53 = vsel %vm68_vm0, %v67_v52, 0.0 }
  0x1e   :  { %345 = vadd.xlane.f32.xlu2 %v344_v23  ;;  %277 = vadd.xlane.f32.xlu1 %v276_v24  ;;  %v242_v56 = vsel %vm68_vm0, %v240_v55, 0.0 }
  0x1f   :  { %314 = vadd.xlane.f32.xlu0 %v313_v27 }
  0x26   :  { %140 = vadd.xlane.f32.xlu2 %v139_v32  ;;  %108 = vadd.xlane.f32.xlu1 %v107_v33 }
  0x27   :  { %105 = vadd.xlane.f32.xlu0 %v104_v36 }
  0x2e   :  { %178 = vadd.xlane.f32.xlu2 %v177_v42  ;;  %175 = vadd.xlane.f32.xlu1 %v174_v43 }
  0x2f   :  { %143 = vadd.xlane.f32.xlu0 %v142_v45 }
  0x36   :  { %70 = vadd.xlane.f32.xlu2 %v69_v49  ;;  %243 = vadd.xlane.f32.xlu1 %v242_v56 }
  0x37   :  { %246 = vadd.xlane.f32.xlu0 %v245_v50 }
  0x3f   :  { %73 = vadd.xlane.f32.xlu0 %v72_v53 }
  0x89   :  { %v349_v57 = vpop.xlane.xlu1 %348  ;;  %v312_v58 = vpop.xlane.xlu2 %311 }
  0x8a   :  { %v351_v59 = vmax.f32 %v349_v57, 1e-24  ;;  %v769_v60 = vmax.f32 %v312_v58, 1e-24  ;;  %v281_v61 = vpop.xlane.xlu0 %280 }
  0x8b   :  { %v771_v62 = vmax.f32 %v281_v61, 1e-24 }
  0x8c   :  { %504 = vrsqrt.f32 %v351_v59  ;;  %vm368_vm1 = vweird.f32 %v351_v59  ;;  %vm324_vm3 = vweird.f32 %v769_v60 }
  0x8d   :  { %506 = vrsqrt.f32 %v769_v60  ;;  %vm300_vm4 = vweird.f32 %v771_v62 }
  0x8e   :  { %508 = vrsqrt.f32 %v771_v62 }
  0x91   :  { %v346_v63 = vpop.xlane.xlu2 %345  ;;  %v278_v0 = vpop.xlane.xlu1 %277 }
  0x92   :  { %v775_v1 = vpop.eup %504  ;;  %v777_v2 = vmax.f32 %v346_v63, 1e-24  ;;  %v315_v3 = vpop.xlane.xlu0 %314  ;;  %v779_v4 = vmax.f32 %v278_v0, 1e-24 }
  0x93   :  { %v781_v5 = vpop.eup %506  ;;  %v363_v10 = vmul.f32 %v775_v1, %v351_v59  ;;  %v784_v11 = vmax.f32 %v315_v3, 1e-24  ;;  %vm369_vm2 = vweird.f32 %v775_v1 }
  0x94   :  { %v786_v12 = vpop.eup %508  ;;  %v319_v15 = vmul.f32 %v781_v5, %v769_v60  ;;  %510 = vrsqrt.f32 %v777_v2  ;;  %vm325_vm5 = vweird.f32 %v781_v5  ;;  %vm358_vm6 = vweird.f32 %v777_v2  ;;  %vm835_vm10 = vmor %vm368_vm1, %vm369_vm2 }
  0x95   :  { %v364_v16 = vmul.f32 %v775_v1, %v363_v10  ;;  %v295_v17 = vmul.f32 %v786_v12, %v771_v62  ;;  %512 = vrsqrt.f32 %v784_v11  ;;  %vm301_vm7 = vweird.f32 %v786_v12  ;;  %vm847_vm12 = vmor %vm324_vm3, %vm325_vm5 }
  0x96   :  { %v320_v18 = vmul.f32 %v781_v5, %v319_v15  ;;  %514 = vrsqrt.f32 %v779_v4  ;;  %vm334_vm8 = vweird.f32 %v784_v11  ;;  %vm862_vm13 = vmor %vm300_vm4, %vm301_vm7  ;;  %vm290_vm1 = vweird.f32 %v779_v4 }
  0x97   :  { %v365_v19 = vmul.f32 0.5, %v364_v16  ;;  %v296_v20 = vmul.f32 %v786_v12, %v295_v17 }
  0x98   :  { %v321_v21 = vmul.f32 0.5, %v320_v18 }
  0x99   :  { %v297_v22 = vmul.f32 0.5, %v296_v20  ;;  %v141_v23 = vpop.xlane.xlu2 %140  ;;  %v109_v24 = vpop.xlane.xlu1 %108  ;;  %v366_v29 = vsub.f32 1.5, %v365_v19 }
  0x9a   :  { %v798_v27 = vpop.eup %510  ;;  %v800_v30 = vmax.f32 %v141_v23, 1e-24  ;;  %v802_v31 = vmax.f32 %v109_v24, 1e-24  ;;  %v106_v32 = vpop.xlane.xlu0 %105  ;;  %v322_v39 = vsub.f32 1.5, %v321_v21 }
  0x9b   :  { %v804_v33 = vpop.eup %512  ;;  %v353_v36 = vmul.f32 %v798_v27, %v777_v2  ;;  %v298_v40 = vsub.f32 1.5, %v297_v22  ;;  %v367_v45 = vmul.f32 %v775_v1, %v366_v29  ;;  %v827_v50 = vmax.f32 %v106_v32, 1e-24 }
  0x9c   :  { %v811_v38 = vpop.eup %514  ;;  %v329_v41 = vmul.f32 %v804_v33, %v784_v11  ;;  %516 = vrsqrt.f32 %v800_v30  ;;  %v323_v52 = vmul.f32 %v781_v5, %v322_v39  ;;  %vm359_vm9 = vweird.f32 %v798_v27 }
  0x9d   :  { %v354_v42 = vmul.f32 %v798_v27, %v353_v36  ;;  %v285_v43 = vmul.f32 %v811_v38, %v779_v4  ;;  %518 = vrsqrt.f32 %v802_v31  ;;  %v299_v53 = vmul.f32 %v786_v12, %v298_v40  ;;  %vm876_vm15 = vmor %vm358_vm6, %vm359_vm9 }
  0x9e   :  { %v330_v47 = vmul.f32 %v804_v33, %v329_v41  ;;  %vm335_vm11 = vweird.f32 %v804_v33  ;;  %520 = vrsqrt.f32 %v827_v50  ;;  %v371_v16 = vsel %vm835_vm10, %v775_v1, %v367_v45 }
  0x9f   :  { %v355_v48 = vmul.f32 0.5, %v354_v42  ;;  %v286_v49 = vmul.f32 %v811_v38, %v285_v43  ;;  %vm291_vm14 = vweird.f32 %v811_v38  ;;  %v303_v22 = vsel %vm862_vm13, %v786_v12, %v299_v53  ;;  %vm890_vm2 = vmor %vm334_vm8, %vm335_vm11 }
  0xa0   :  { %v331_v55 = vmul.f32 0.5, %v330_v47  ;;  %v373_v4 = vmul.f32 %v371_v16, %v685_v6  ;;  %v327_v29 = vsel %vm847_vm12, %v781_v5, %v323_v52  ;;  %vm292_vm3 = vmor %vm290_vm1, %vm291_vm14  ;;  %vm128_vm5 = vweird.f32 %v802_v31 }
  0xa1   :  { %v356_v57 = vsub.f32 1.5, %v355_v48  ;;  %v287_v58 = vmul.f32 0.5, %v286_v49  ;;  %v179_v61 = vpop.xlane.xlu2 %178  ;;  %v176_v63 = vpop.xlane.xlu1 %175  ;;  %vm118_vm8 = vweird.f32 %v827_v50  ;;  %vm153_vm14 = vweird.f32 %v800_v30 }
  0xa2   :  { %v841_v0 = vpop.eup %516  ;;  %v332_v3 = vsub.f32 1.5, %v331_v55  ;;  %v851_v10 = vmax.f32 %v179_v61, 1e-24  ;;  %v853_v15 = vmax.f32 %v176_v63, 1e-24  ;;  %v144_v20 = vpop.xlane.xlu0 %143 }
  0xa3   :  { %v357_v60 = vmul.f32 %v798_v27, %v356_v57  ;;  %v288_v18 = vsub.f32 1.5, %v287_v58  ;;  %v148_v19 = vmul.f32 %v841_v0, %v800_v30  ;;  %v870_v21 = vpop.eup %518  ;;  %v903_v11 = vmax.f32 %v144_v20, 1e-24 }
  0xa4   :  { %v333_v1 = vmul.f32 %v804_v33, %v332_v3  ;;  %522 = vrsqrt.f32 %v851_v10  ;;  %v123_v24 = vmul.f32 %v870_v21, %v802_v31  ;;  %v521_v36 = vpop.eup %520  ;;  %vm129_vm4 = vweird.f32 %v870_v21 }
  0xa5   :  { %v289_v23 = vmul.f32 %v811_v38, %v288_v18  ;;  %v149_v12 = vmul.f32 %v841_v0, %v148_v19  ;;  %524 = vrsqrt.f32 %v853_v15  ;;  %v361_v32 = vsel %vm876_vm15, %v798_v27, %v357_v60  ;;  %vm130_vm7 = vmor %vm128_vm5, %vm129_vm4 }
  0xa6   :  { %v124_v39 = vmul.f32 %v870_v21, %v123_v24  ;;  %v372_v40 = vmul.f32 %v361_v32, %v693_v9  ;;  %v337_v5 = vsel %vm890_vm2, %v804_v33, %v333_v1  ;;  %v113_v41 = vmul.f32 %v521_v36, %v827_v50 }
  0xa7   :  { %v293_v6 = vsel %vm292_vm3, %v811_v38, %v289_v23  ;;  %526 = vrsqrt.f32 %v903_v11  ;;  %v305_v27 = vmul.f32 %v303_v22, %v690_v8  ;;  %v150_v48 = vmul.f32 0.5, %v149_v12 }
  0xa8   :  { %v125_v42 = vmul.f32 0.5, %v124_v39  ;;  %v304_v43 = vmul.f32 %v293_v6, %v702_v13  ;;  %v484_v45 = vpack.i.bf16 %v372_v40, %v373_v4  ;;  %v114_v49 = vmul.f32 %v521_v36, %v113_v41 }
  0xa9   :  { %v338_v38 = vmul.f32 %v327_v29, %v688_v7  ;;  %v339_v9 = vmul.f32 %v337_v5, %v704_v14  ;;  %v151_v61 = vsub.f32 1.5, %v150_v48  ;;  %vm119_vm6 = vweird.f32 %v521_v36  ;;  %v71_v5 = vpop.xlane.xlu2 %70 }
  0xaa   :  { %v523_v47 = vpop.eup %522  ;;  %v126_v52 = vsub.f32 1.5, %v125_v42  ;;  %485 = vrot.lane.b32.xlu0 %v484_v45, %s643_s2  ;;  %v115_v13 = vmul.f32 0.5, %v114_v49  ;;  %v474_v55 = vpack.i.bf16 %v304_v43, %v305_v27  ;;  %vm154_vm9 = vweird.f32 %v841_v0  ;;  %vm120_vm11 = vmor %vm118_vm8, %vm119_vm6 }
  0xab   :  { %v193_v33 = vmul.f32 %v523_v47, %v851_v10  ;;  %v525_v53 = vpop.eup %524  ;;  %v479_v8 = vpack.i.bf16 %v338_v38, %v339_v9  ;;  %vm199_vm10 = vweird.f32 %v523_v47  ;;  %v152_v20 = vmul.f32 %v841_v0, %v151_v61  ;;  %vm155_vm3 = vmor %vm153_vm14, %vm154_vm9 }
  0xac   :  { %v127_v56 = vmul.f32 %v870_v21, %v126_v52  ;;  %v183_v58 = vmul.f32 %v525_v53, %v853_v15  ;;  %v116_v14 = vsub.f32 1.5, %v115_v13  ;;  %475 = vrot.lane.b32.xlu1 %v474_v55, %s644_s27  ;;  %vm198_vm12 = vweird.f32 %v851_v10 }
  0xad   :  { %v194_v57 = vmul.f32 %v523_v47, %v193_v33  ;;  %v527_v7 = vpop.eup %526  ;;  %480 = vrot.lane.b32.xlu2 %v479_v8, %s645_s28  ;;  %vm189_vm13 = vweird.f32 %v525_v53  ;;  %vm200_vm15 = vmor %vm198_vm12, %vm199_vm10  ;;  %vm188_vm1 = vweird.f32 %v853_v15  ;;  %vm163_vm5 = vweird.f32 %v903_v11 }
  0xae   :  { %v184_v59 = vmul.f32 %v525_v53, %v183_v58  ;;  %v158_v3 = vmul.f32 %v527_v7, %v903_v11  ;;  %v117_v31 = vmul.f32 %v521_v36, %v116_v14  ;;  %v131_v16 = vsel %vm130_vm7, %v870_v21, %v127_v56  ;;  %vm190_vm4 = vmor %vm188_vm1, %vm189_vm13  ;;  %v247_v11 = vpop.xlane.xlu0 %246 }
  0xaf   :  { %v195_v63 = vmul.f32 0.5, %v194_v57  ;;  %v133_v19 = vmul.f32 %v131_v16, %v719_v26  ;;  %vm164_vm2 = vweird.f32 %v527_v7  ;;  %v249_v6 = vmax.f32 %v247_v11, 1e-24 }
  0xb0   :  { %v185_v60 = vmul.f32 0.5, %v184_v59  ;;  %v159_v18 = vmul.f32 %v527_v7, %v158_v3  ;;  %v121_v50 = vsel %vm120_vm11, %v521_v36, %v117_v31  ;;  %vm165_vm6 = vmor %vm163_vm5, %vm164_vm2  ;;  %vm230_vm13 = vcmask 523264  }
  0xb1   :  { %v196_v17 = vsub.f32 1.5, %v195_v63  ;;  %v132_v2 = vmul.f32 %v121_v50, %v722_v28  ;;  %v156_v28 = vsel %vm155_vm3, %v841_v0, %v152_v20  ;;  %528 = vrsqrt.f32 %v249_v6 }
  0xb2   :  { %v186_v1 = vsub.f32 1.5, %v185_v60  ;;  %v160_v22 = vmul.f32 0.5, %v159_v18  ;;  %v167_v12 = vmul.f32 %v156_v28, %v717_v25  ;;  %v75_v25 = vmax.f32 %v71_v5, 1e-24 }
  0xb3   :  { %v197_v62 = vmul.f32 %v523_v47, %v196_v17  ;;  %v489_v10 = vpack.i.bf16 %v133_v19, %v132_v2  ;;  %vm266_vm7 = vweird.f32 %v249_v6  ;;  %vm233_vm14 = vcmask 785408  }
  0xb4   :  { %v187_v26 = vmul.f32 %v525_v53, %v186_v1  ;;  %v161_v21 = vsub.f32 1.5, %v160_v22 }
  0xb5   :  { %v201_v23 = vsel %vm200_vm15, %v523_v47, %v197_v62  ;;  %490 = vrot.lane.b32.xlu2 %v489_v10, %s644_s27  ;;  %vm83_vm15 = vweird.f32 %v75_v25 }
  0xb6   :  { %v203_v24 = vmul.f32 %v201_v23, %v732_v34  ;;  %v162_v4 = vmul.f32 %v527_v7, %v161_v21  ;;  %v191_v30 = vsel %vm190_vm4, %v525_v53, %v187_v26  ;;  %v244_v34 = vpop.xlane.xlu1 %243  ;;  %v74_v41 = vpop.xlane.xlu0 %73 }
  0xb7   :  { %v202_v15 = vmul.f32 %v191_v30, %v734_v35  ;;  %v248_v40 = vmax.f32 %v244_v34, 1e-24  ;;  %v529_v0 = vpop.eup %528  ;;  %v76_v43 = vmax.f32 %v74_v41, 1e-24 }
  0xb8   :  { %v166_v29 = vsel %vm165_vm6, %v527_v7, %v162_v4  ;;  %v261_v42 = vmul.f32 %v529_v0, %v249_v6  ;;  %vm267_vm8 = vweird.f32 %v529_v0 }
  0xb9   :  { %v168_v32 = vmul.f32 %v166_v29, %v737_v37  ;;  %v499_v36 = vpack.i.bf16 %v203_v24, %v202_v15  ;;  %530 = vrsqrt.f32 %v248_v40  ;;  %vm256_vm9 = vweird.f32 %v248_v40  ;;  %vm268_vm11 = vmor %vm266_vm7, %vm267_vm8 }
  0xba   :  { %v262_v27 = vmul.f32 %v529_v0, %v261_v42  ;;  %532 = vrsqrt.f32 %v75_v25  ;;  %vm93_vm2 = vweird.f32 %v76_v43 }
  0xbb   :  { %v494_v39 = vpack.i.bf16 %v168_v32, %v167_v12  ;;  %500 = vrot.lane.b32.xlu0 %v499_v36, %s643_s2  ;;  %534 = vrsqrt.f32 %v76_v43 }
  0xbc   :  { %v263_v47 = vmul.f32 0.5, %v262_v27 }
  0xbd   :  { %495 = vrot.lane.b32.xlu1 %v494_v39, %s645_s28 }
  0xbe   :  { %v264_v9 = vsub.f32 1.5, %v263_v47 }
  0xbf   :  { %v531_v35 = vpop.eup %530 }
  0xc0   :  { %v251_v37 = vmul.f32 %v531_v35, %v248_v40  ;;  %v533_v49 = vpop.eup %532  ;;  %vm257_vm10 = vweird.f32 %v531_v35  ;;  %v265_v13 = vmul.f32 %v529_v0, %v264_v9 }
  0xc1   :  { %v535_v38 = vpop.eup %534  ;;  %v78_v52 = vmul.f32 %v533_v49, %v75_v25  ;;  %vm258_vm12 = vmor %vm256_vm9, %vm257_vm10  ;;  %vm84_vm1 = vweird.f32 %v533_v49 }
  0xc2   :  { %v252_v45 = vmul.f32 %v531_v35, %v251_v37  ;;  %v88_v53 = vmul.f32 %v535_v38, %v76_v43  ;;  %v269_v57 = vsel %vm268_vm11, %v529_v0, %v265_v13  ;;  %vm94_vm3 = vweird.f32 %v535_v38  ;;  %vm85_vm4 = vmor %vm83_vm15, %vm84_vm1 }
  0xc3   :  { %v79_v55 = vmul.f32 %v533_v49, %v78_v52  ;;  %v271_v63 = vmul.f32 %v269_v57, %v750_v46  ;;  %vm95_vm5 = vmor %vm93_vm2, %vm94_vm3  ;;  %v647_v43 = vmov 0.0  }
  0xc4   :  { %v253_v48 = vmul.f32 0.5, %v252_v45  ;;  %v89_v56 = vmul.f32 %v535_v38, %v88_v53 }
  0xc5   :  { %v80_v58 = vmul.f32 0.5, %v79_v55 }
  0xc6   :  { %v254_v33 = vsub.f32 1.5, %v253_v48  ;;  %v90_v61 = vmul.f32 0.5, %v89_v56 }
  0xc7   :  { %v81_v60 = vsub.f32 1.5, %v80_v58 }
  0xc8   :  { %v255_v8 = vmul.f32 %v531_v35, %v254_v33  ;;  %v91_v19 = vsub.f32 1.5, %v90_v61 }
  0xc9   :  { %v82_v26 = vmul.f32 %v533_v49, %v81_v60 }
  0xca   :  { %v259_v7 = vsel %vm258_vm12, %v531_v35, %v255_v8  ;;  %v92_v2 = vmul.f32 %v535_v38, %v91_v19 }
  0xcb   :  { %v270_v31 = vmul.f32 %v259_v7, %v764_v54  ;;  %v86_v24 = vsel %vm85_vm4, %v533_v49, %v82_v26 }
  0xcc   :  { %v96_v23 = vsel %vm95_vm5, %v535_v38, %v92_v2  ;;  %v97_v30 = vmul.f32 %v86_v24, %v747_v44 }
  0xcd   :  { %v98_v28 = vmul.f32 %v96_v23, %v758_v51 }
 0x107   :  { %v481_v14 = vpop.permute.xlu2 %480 }
 0x108   :  { %v482_v18 = vunpack.i.l.bf16 %v481_v14  ;;  %v483_v1 = vunpack.i.h.bf16 %v481_v14 }
 0x10f   :  { %v491_v4 = vpop.permute.xlu2 %490 }
 0x110   :  { %v493_v15 = vunpack.i.h.bf16 %v491_v4  ;;  %v492_v29 = vunpack.i.l.bf16 %v491_v4 }
 0x112   :  { %v228_v6 = vsel %vm68_vm0, %v97_v30, %v492_v29  ;;  %v229_v40 = vsel %vm68_vm0, %v98_v28, %v493_v15 }
 0x11c   :  { %v486_v3 = vpop.permute.xlu0 %485 }
 0x11d   :  { %v487_v20 = vunpack.i.l.bf16 %v486_v3  ;;  %v488_v21 = vunpack.i.h.bf16 %v486_v3 }
 0x11e   :  { %v476_v59 = vpop.permute.xlu1 %475 }
 0x11f   :  { %v478_v16 = vunpack.i.h.bf16 %v476_v59  ;;  %v477_v17 = vunpack.i.l.bf16 %v476_v59 }
 0x121   :  { %v399_v50 = vsel %vm68_vm0, %v271_v63, %v477_v17  ;;  %v398_v62 = vsel %vm68_vm0, %v270_v31, %v478_v16  ;;  %vm437_vm0 = vcmask 130048  }
 0x122   :  { %v401_v46 = vsel %vm230_vm13, %v399_v50, %v482_v18  ;;  %v400_v22 = vsel %vm230_vm13, %v398_v62, %v483_v1 }
 0x123   :  { %v403_v54 = vsel %vm233_vm14, %v401_v46, %v487_v20  ;;  %v402_v10 = vsel %vm233_vm14, %v400_v22, %v488_v21 }
 0x124   :  { %418 = vmatpush.xpose.msra.mxu0 %v403_v54  ;;  %462 = vmatpush.xpose.msra.mxu1 %v403_v54 }
 0x128   :  { %419 = vmatpush.xpose.msra.mxu0 %v402_v10  ;;  %463 = vmatpush.xpose.msra.mxu1 %v402_v10 }
 0x12d   :  { %v501_v12 = vpop.permute.xlu0 %500 }
 0x12e   :  { %v503_v36 = vunpack.i.h.bf16 %v501_v12  ;;  %v502_v39 = vunpack.i.l.bf16 %v501_v12 }
 0x12f   :  { %v496_v32 = vpop.permute.xlu1 %495 }
 0x130   :  { %v498_v34 = vunpack.i.h.bf16 %v496_v32  ;;  %v497_v11 = vunpack.i.l.bf16 %v496_v32 }
 0x132   :  { %v231_v0 = vsel %vm230_vm13, %v228_v6, %v497_v11  ;;  %v232_v5 = vsel %vm230_vm13, %v229_v40, %v498_v34 }
 0x133   :  { %v234_v51 = vsel %vm233_vm14, %v231_v0, %v502_v39  ;;  %v235_v44 = vsel %vm233_vm14, %v232_v5, %v503_v36 }
 0x134   :  { %420 = vmatmul.f32.vlgmr.msra.gmra.mxu0 %v234_v51  ;;  %423 = vmatmul.f32.vlgmr.msra.gmra.mxu1 %v235_v44 }
 0x1b1   :  { %v421_v35 = vpop.f32.mrf.mxu0  ;;  %v424_v41 = vpop.f32.mrf.mxu1 }
 0x1b2   :  { %v427_v42 = vmul.f32 0.25, %v421_v35  ;;  %v428_v25 = vmul.f32 0.25, %v424_v41 }
 0x1b4   :  { %vm429_vm6 = vcmp.gt.f32.partialorder %v427_v42, 0.3  ;;  %vm430_vm7 = vcmp.gt.f32.partialorder %v428_v25, 0.3 }
 0x1b5   :  { %v460_v37 = vsel %vm429_vm6, 1.0, %v647_v43  ;;  %v461_v27 = vsel %vm430_vm7, 1.0, %v647_v43 }
 0x1b6   :  { %v435_v45 = vmul.f32 %v460_v37, %v427_v42  ;;  %v436_v47 = vmul.f32 %v461_v27, %v428_v25 }
 0x1b8   :  { %438 = vst.msk [vmem:[#allocation8] sm:$0xff] %vm437_vm0, %v435_v45 }
 0x1b9   :  { %439 = vst.msk [vmem:[#allocation8 + $0x8] sm:$0xff] %vm437_vm0, %v436_v47 }
 0x1ba   :  { %452 = dma.vmem_to_hbm [thread:$0]  %s445_s30, 256, %s447_s6, [#allocation4], %s639_s20, %s639_s20, %s640_s21  }
 0x1bb   :  { %636 = dma.done.wait [#allocation4], 256  }
 0x1bc   :  { %637 = vsyncadd [#allocation4], 4294967040 }
 0x1bd   :  { %457 = vsyncpa [#allocation3], 1 }
 0x1be   :  { %458 = vsyncpa [#allocation6], 1 }
 0x1bf   :  { %459 = vsyncpa [#allocation4], 1 }

</bundles_post_ra>
